<compile_context>
chip_gen: v7x
topology: tpu7x:2x2x1
jax: 0.10.0
libtpu: 0.0.40
codegen_flags: <defaults>
</compile_context>

<pallas_src>
import jax
import jax.numpy as jnp
from jax.experimental import pallas as pl
from jax.experimental.pallas import tpu as pltpu

_LANE = 128
# <= 1024 rows -> <= 512 KiB per operand: comfortably one VMEM block, so take
# the single-step path and avoid all grid/accumulator overhead.
_SINGLE_BLOCK_MAX_ROWS = 1024


def _mul_sum_single_kernel(x1_ref, x2_ref, out_ref):
    # Whole problem in one block: multiply, reduce, store the scalar once.
    out_ref[0, 0] = jnp.sum(x1_ref[...] * x2_ref[...])


def _mul_sum_tiled_kernel(x1_ref, x2_ref, out_ref, acc_ref):
    # Large-input path: keep per-step work to loads + vmul + vadd into a VMEM
    # vector accumulator; do the expensive cross-lane reduction and the scalar
    # SMEM store only once, on the final grid step.
    @pl.when(pl.program_id(0) == 0)
    def _():
        acc_ref[...] = jnp.zeros_like(acc_ref)

    acc_ref[...] += x1_ref[...] * x2_ref[...]

    @pl.when(pl.program_id(0) == pl.num_programs(0) - 1)
    def _():
        out_ref[0, 0] = jnp.sum(acc_ref[...])


def kernel_linear(x1, x2, *, tile_rows=512):
    """Pallas equivalent of (x1 * x2).sum() -> scalar float32."""
    assert x1.shape == x2.shape
    n = x1.size

    x1f = jnp.ravel(x1).astype(jnp.float32)
    x2f = jnp.ravel(x2).astype(jnp.float32)

    # Pad flat length to a multiple of the lane width (zeros don't change the
    # sum of products). For the (2, 4, 16, 16) case this is a no-op.
    pad = (-n) % _LANE
    if pad:
        x1f = jnp.pad(x1f, (0, pad))
        x2f = jnp.pad(x2f, (0, pad))
    x1f = x1f.reshape(-1, _LANE)
    x2f = x2f.reshape(-1, _LANE)
    m = x1f.shape[0]

    if m <= _SINGLE_BLOCK_MAX_ROWS:
        # Single-step fast path: one block covering the whole slab.
        out = pl.pallas_call(
            _mul_sum_single_kernel,
            out_shape=jax.ShapeDtypeStruct((1, 1), jnp.float32),
            grid=(1,),
            in_specs=[
                pl.BlockSpec((m, _LANE), lambda i: (0, 0)),
                pl.BlockSpec((m, _LANE), lambda i: (0, 0)),
            ],
            out_specs=pl.BlockSpec(
                (1, 1), lambda i: (0, 0), memory_space=pltpu.SMEM
            ),
        )(x1f, x2f)
        return out[0, 0]

    # General large-input path: big tiles + VMEM vector accumulator.
    # TODO(synk): for very large inputs the zero-pad below is an extra HBM
    # round-trip; a masked tail block would avoid it.
    rows_pad = (-m) % tile_rows
    if rows_pad:
        x1f = jnp.pad(x1f, ((0, rows_pad), (0, 0)))
        x2f = jnp.pad(x2f, ((0, rows_pad), (0, 0)))
        m += rows_pad

    out = pl.pallas_call(
        _mul_sum_tiled_kernel,
        out_shape=jax.ShapeDtypeStruct((1, 1), jnp.float32),
        grid=(m // tile_rows,),
        in_specs=[
            pl.BlockSpec((tile_rows, _LANE), lambda i: (i, 0)),
            pl.BlockSpec((tile_rows, _LANE), lambda i: (i, 0)),
        ],
        out_specs=pl.BlockSpec(
            (1, 1), lambda i: (0, 0), memory_space=pltpu.SMEM
        ),
        scratch_shapes=[pltpu.VMEM((tile_rows, _LANE), jnp.float32)],
        compiler_params=pltpu.CompilerParams(
            dimension_semantics=("arbitrary",)
        ),
    )(x1f, x2f)
    return out[0, 0]


if __name__ == "__main__":
    key = jax.random.PRNGKey(0)
    k1, k2 = jax.random.split(key)
    shape = (2, 4, 16, 16)  # NCHW, matches the PyTorch module's test inputs
    x1 = jax.random.normal(k1, shape, dtype=jnp.float32)
    x2 = jax.random.normal(k2, shape, dtype=jnp.float32)

    result = kernel_linear(x1, x2)
    jax.block_until_ready(result)

    ref = jnp.sum(x1 * x2)
    assert jnp.allclose(result, ref, rtol=1e-5, atol=1e-5), (result, ref)
    print("KERNEL_OK")
</pallas_src>

<mosaic_0001>
module attributes {stable_mosaic.version = 11 : i64} {
  func.func @_mul_sum_single_kernel(%arg0: i32, %arg1: memref<16x128xf32, #tpu.memory_space<vmem>>, %arg2: memref<16x128xf32, #tpu.memory_space<vmem>>, %arg3: memref<1x1xf32, #tpu.memory_space<smem>>) attributes {dimension_semantics = [#tpu.dimension_semantics<arbitrary>], iteration_bounds = array<i64: 1>, scalar_prefetch = 0 : i64, scratch_operands = 0 : i64, tpu.core_type = #tpu.core_type<tc>, window_params = [{pipeline_mode = #tpu.pipeline_mode<synchronous>, transform_indices = @transform_0, window_bounds = array<i64: 16, 128>}, {pipeline_mode = #tpu.pipeline_mode<synchronous>, transform_indices = @transform_1, window_bounds = array<i64: 16, 128>}, {transform_indices = @transform_2, window_bounds = array<i64: 1, 1>}]} {
    %c0 = arith.constant 0 : index
    %c0_0 = arith.constant 0 : index
    %0 = vector.load %arg1[%c0, %c0_0] : memref<16x128xf32, #tpu.memory_space<vmem>>, vector<16x128xf32>
    %c0_1 = arith.constant 0 : index
    %c0_2 = arith.constant 0 : index
    %1 = vector.load %arg2[%c0_1, %c0_2] : memref<16x128xf32, #tpu.memory_space<vmem>>, vector<16x128xf32>
    %2 = arith.mulf %0, %1 : vector<16x128xf32>
    %3 = vector.shape_cast %2 : vector<16x128xf32> to vector<1x16x128xf32>
    %cst = arith.constant dense<0.000000e+00> : vector<1xf32>
    %4 = vector.multi_reduction <add>, %3, %cst [1, 2] : vector<1x16x128xf32> to vector<1xf32>
    %5 = vector.shape_cast %4 : vector<1xf32> to vector<1x1x1xf32>
    %6 = vector.extract %5[0, 0, 0] : f32 from vector<1x1x1xf32>
    %c0_3 = arith.constant 0 : index
    %c0_4 = arith.constant 0 : index
    %7 = memref.load %arg3[%c0_3, %c0_4] : memref<1x1xf32, #tpu.memory_space<smem>>
    memref.store %6, %arg3[%c0_3, %c0_4] : memref<1x1xf32, #tpu.memory_space<smem>>
    return
  }
  func.func @transform_0(%arg0: i32) -> (i32, i32) {
    %c0_i32 = arith.constant 0 : i32
    %c0_i32_0 = arith.constant 0 : i32
    %c0_i32_1 = arith.constant 0 : i32
    return %c0_i32, %c0_i32_0 : i32, i32
  }
  func.func @transform_1(%arg0: i32) -> (i32, i32) {
    %c0_i32 = arith.constant 0 : i32
    %c0_i32_0 = arith.constant 0 : i32
    %c0_i32_1 = arith.constant 0 : i32
    return %c0_i32, %c0_i32_0 : i32, i32
  }
  func.func @transform_2(%arg0: i32) -> (i32, i32) {
    %c0_i32 = arith.constant 0 : i32
    %c0_i32_0 = arith.constant 0 : i32
    %c0_i32_1 = arith.constant 0 : i32
    return %c0_i32, %c0_i32_0 : i32, i32
  }
}

</mosaic_0001>

<bundles_post_ra>
// kernel: tpu_custom_call.1
= control target key start
LH: loop header
LB: loop body
LE: loop exit
PB: predicated region body
PF: predicated region fallthrough
CT: control target
= control target key end

     0   :  { %7 = vsyncpa [#allocation3], 0  ;;  %s196_s0 = inlined_call_operand.hbm [shape: f32[16,128], index: 0, kind: input, shape index: {}]   ;;  %s197_s1 = inlined_call_operand.hbm [shape: f32[16,128], index: 1, kind: input, shape index: {}]   ;;  %s198_s2 = inlined_call_operand.hbm [shape: f32[1,1], index: 2, kind: output, shape index: {}]  }
   0x1   :  { %8 = vsyncpa [#allocation6], 0 }
   0x2   :  { %9 = vsyncpa [#allocation4], 0  ;;  %s140_s9 = smov [#allocation2]   ;;  %s80_s13 = scalar_lea.hbm %s196_s0, 256 }
   0x3   :  { %s15_s10 = sshll.u32 %s140_s9, 4  ;;  %p81_p0 = scmp.ne.s32.totalorder %s196_s0, %s80_s13  ;;  %s16_s10 = int_to_ptr.vmem [resolvable:$true] %s15_s10 }
   0x4   :  { %p84_p1 = scmp.lt.u32.totalorder %s80_s13, %s196_s0 }
   0x6   :  { %p86_p2 = pnand %p84_p1, %p81_p0 }
   0x8   :  { %89 = shalt.err (!%p86_p2)
}
   0x9   :  { %s90_s18 = scalar_lea.vmem %s16_s10, 256  ;;  %p95_p4 = scmp.lt.s32.totalorder %s16_s10, %s16_s10 }
   0xa   :  { %p91_p3 = scmp.ne.s32.totalorder %s16_s10, %s90_s18  ;;  %p96_p5 = scmp.lt.s32.totalorder %s90_s18, %s90_s18 }
   0xc   :  { %p97_p6 = por %p96_p5, %p95_p4 }
   0xe   :  { %p98_p7 = pnand %p97_p6, %p91_p3 }
  0x10   :  { %101 = shalt.err (!%p98_p7)
}
  0x11   :  { %s141_s19 = smov 128   ;;  %s142_s20 = smov 8  }
  0x12   :  { %21 = dma.hbm_to_vmem [thread:$0]  %s196_s0, 256, %s16_s10, [#allocation3], %s141_s19, %s141_s19, %s142_s20  }
  0x13   :  { %s143_s23 = smov [#allocation5]   ;;  %s102_s27 = scalar_lea.hbm %s197_s1, 256 }
  0x14   :  { %s27_s24 = sshll.u32 %s143_s23, 4  ;;  %p103_p8 = scmp.ne.s32.totalorder %s197_s1, %s102_s27  ;;  %s28_s24 = int_to_ptr.vmem [resolvable:$true] %s27_s24 }
  0x15   :  { %p106_p9 = scmp.lt.u32.totalorder %s102_s27, %s197_s1 }
  0x17   :  { %p108_p10 = pnand %p106_p9, %p103_p8 }
  0x19   :  { %111 = shalt.err (!%p108_p10)
}
  0x1a   :  { %s112_s4 = scalar_lea.vmem %s28_s24, 256  ;;  %p117_p12 = scmp.lt.s32.totalorder %s28_s24, %s28_s24 }
  0x1b   :  { %p113_p11 = scmp.ne.s32.totalorder %s28_s24, %s112_s4  ;;  %p118_p13 = scmp.lt.s32.totalorder %s112_s4, %s112_s4 }
  0x1d   :  { %p119_p0 = por %p118_p13, %p117_p12 }
  0x1f   :  { %p120_p1 = pnand %p119_p0, %p113_p11 }
  0x21   :  { %123 = shalt.err (!%p120_p1)
}
  0x22   :  { %33 = dma.hbm_to_vmem [thread:$0]  %s197_s1, 256, %s28_s24, [#allocation6], %s141_s19, %s141_s19, %s142_s20  }
  0x23   :  { %134 = dma.done.wait [#allocation3], 256  }
  0x24   :  { %135 = vsyncadd [#allocation3], 4294967040 }
  0x25   :  { %136 = dma.done.wait [#allocation6], 256  }
  0x26   :  { %137 = vsyncadd [#allocation6], 4294967040  ;;  %v40_v0 = vld [vmem:[#allocation2] sm:$0xff]  ;;  %v41_v1 = vld [vmem:[#allocation2 + $0x8] sm:$0xff]  ;;  %s124_s8 = scalar_lea.hbm %s198_s2, 16 }
  0x27   :  { %v42_v2 = vld [vmem:[#allocation5] sm:$0xff]  ;;  %v43_v3 = vld [vmem:[#allocation5 + $0x8] sm:$0xff]  ;;  %p125_p2 = scmp.ne.s32.totalorder %s198_s2, %s124_s8  ;;  %p128_p3 = scmp.lt.u32.totalorder %s124_s8, %s198_s2 }
  0x28   :  { %v44_v4 = vmul.f32 %v42_v2, %v40_v0  ;;  %v45_v5 = vmul.f32 %v43_v3, %v41_v1 }
  0x29   :  { %p130_p4 = pnand %p128_p3, %p125_p2 }
  0x2a   :  { %v46_v6 = vadd.f32 %v45_v5, %v44_v4 }
  0x2c   :  { %47 = vadd.xlane.f32.xlu0 %v46_v6 }
  0xb9   :  { %v48_v7 = vpop.xlane.xlu0 %47 }
  0xba   :  { %v49_v8 = vrot.slane %v48_v7, 4 }
  0xbc   :  { %v50_v9 = vadd.f32 %v49_v8, %v48_v7 }
  0xbe   :  { %v51_v10 = vrot.slane %v50_v9, 2 }
  0xc0   :  { %v52_v11 = vadd.f32 %v51_v10, %v50_v9 }
  0xc2   :  { %v53_v12 = vrot.slane %v52_v11, 1 }
  0xc4   :  { %v54_v13 = vadd.f32 %v53_v12, %v52_v11 }
  0xc6   :  { %73 = vpush %v54_v13 }
  0xf7   :  { %s74_s1 = spop %73 }
  0xf8   :  { %57 = sst [smem:[#allocation7]] %s74_s1 }
  0xf9   :  { %133 = shalt.err (!%p130_p4)
}
  0xfa   :  { %s144_s13 = smov [#allocation7]  }
  0xfb   :  { %65 = dma.smem_to_hbm %s144_s13, 16, %s198_s2, [#allocation4]  }
  0xfc   :  { %138 = dma.done.wait [#allocation4], 16  }
  0xfd   :  { %139 = vsyncadd [#allocation4], 4294967280 }
  0xfe   :  { %69 = sfence }
  0xff   :  { %70 = vsyncpa [#allocation3], 1 }
 0x100   :  { %71 = vsyncpa [#allocation6], 1 }
 0x101   :  { %72 = vsyncpa [#allocation4], 1 }

</bundles_post_ra>
